<compile_context>
chip_gen: v5e
topology: v5e:2x2
jax: 0.10.0
libtpu: 0.0.40
codegen_flags: <defaults>
</compile_context>

<pallas_src>
import jax
import jax.numpy as jnp
from jax.experimental import pallas as pl
from jax.experimental.pallas import tpu as pltpu


HIDDEN = 256


def _round_up(x, m):
    return ((x + m - 1) // m) * m


# ---------------------------------------------------------------------------
# Kernels
# ---------------------------------------------------------------------------
def _policy_kernel_stoch(s_ref, w1_ref, b1_ref, w2_ref, b2_ref,
                         wh_ref, bh_ref, eps_ref, out_ref):
    """Stochastic path: tanh(mu + exp(clip(log_sigma)) * eps).

    wh/bh pack both heads into one lane-dense block:
      mu        in lanes [0, act_dim)
      log_sigma in lanes [HALF, HALF + act_dim)   (HALF = wh width // 2)
    Padding lanes are zero and are sliced away BEFORE exp/tanh, so no
    transcendental work is spent on them.
    """
    half = wh_ref.shape[-1] // 2
    ad = out_ref.shape[-1]

    # l1 + ReLU  (bf16 MXU operands, f32 accumulate, f32 elementwise)
    x = jnp.dot(s_ref[...], w1_ref[...], preferred_element_type=jnp.float32)
    x = jnp.maximum(x + b1_ref[...], 0.0)
    # l2 + ReLU
    x = jnp.dot(x.astype(jnp.bfloat16), w2_ref[...],
                preferred_element_type=jnp.float32)
    x = jnp.maximum(x + b2_ref[...], 0.0)
    # fused packed heads: one (H, 2*HALF) matmul produces [mu | log_sigma]
    h = jnp.dot(x.astype(jnp.bfloat16), wh_ref[...],
                preferred_element_type=jnp.float32) + bh_ref[...]
    mu = h[:, :ad]                                             # (TB, act_dim)
    log_sigma = jnp.clip(h[:, half:half + ad], -20.0, 2.0)     # (TB, act_dim)
    sigma = jnp.exp(log_sigma)
    # reparameterized sample + tanh squash, stored unpadded
    out_ref[...] = jnp.tanh(mu + sigma * eps_ref[...])


def _policy_kernel_det(s_ref, w1_ref, b1_ref, w2_ref, b2_ref,
                       wmu_ref, bmu_ref, out_ref):
    """Deterministic path: tanh(mu) only (no sigma head, no eps)."""
    ad = out_ref.shape[-1]
    x = jnp.dot(s_ref[...], w1_ref[...], preferred_element_type=jnp.float32)
    x = jnp.maximum(x + b1_ref[...], 0.0)
    x = jnp.dot(x.astype(jnp.bfloat16), w2_ref[...],
                preferred_element_type=jnp.float32)
    x = jnp.maximum(x + b2_ref[...], 0.0)
    mu = jnp.dot(x.astype(jnp.bfloat16), wmu_ref[...],
                 preferred_element_type=jnp.float32) + bmu_ref[...]
    out_ref[...] = jnp.tanh(mu[:, :ad])


# ---------------------------------------------------------------------------
# One-time parameter preparation (hoisted out of the per-step forward)
# ---------------------------------------------------------------------------
def prepare_params(params):
    """Cast/pad/pack weights once; the forward only touches activations."""
    H = params["w1"].shape[1]
    act_dim = params["wmu"].shape[1]

    # half-width of the packed head block (128 total lanes when act_dim <= 64)
    half = 64 if act_dim <= 64 else _round_up(act_dim, 128)
    headw = 2 * half
    muw = _round_up(act_dim, 128)          # mu-only head width (det kernel)

    w1 = params["w1"].astype(jnp.bfloat16)
    w2 = params["w2"].astype(jnp.bfloat16)
    b1 = params["b1"].reshape(1, -1).astype(jnp.float32)
    b2 = params["b2"].reshape(1, -1).astype(jnp.float32)

    # packed [mu | log_sigma] head: mu in lanes [0, act_dim), sig in [half, half+act_dim)
    wh = jnp.zeros((H, headw), jnp.float32)
    wh = wh.at[:, :act_dim].set(params["wmu"].astype(jnp.float32))
    wh = wh.at[:, half:half + act_dim].set(params["wsig"].astype(jnp.float32))
    bh = jnp.zeros((1, headw), jnp.float32)
    bh = bh.at[:, :act_dim].set(params["bmu"].reshape(-1).astype(jnp.float32))
    bh = bh.at[:, half:half + act_dim].set(params["bsig"].reshape(-1).astype(jnp.float32))

    # mu-only head (deterministic kernel), padded to a lane-dense width
    wmu = jnp.zeros((H, muw), jnp.float32).at[:, :act_dim].set(
        params["wmu"].astype(jnp.float32))
    bmu = jnp.zeros((1, muw), jnp.float32).at[:, :act_dim].set(
        params["bmu"].reshape(-1).astype(jnp.float32))

    return dict(
        w1=w1, b1=b1, w2=w2, b2=b2,
        wh=wh.astype(jnp.bfloat16), bh=bh,
        wmu=wmu.astype(jnp.bfloat16), bmu=bmu,
        obs_dim=params["w1"].shape[0], hidden=H, act_dim=act_dim,
    )


# ---------------------------------------------------------------------------
# Forward wrapper
# ---------------------------------------------------------------------------
def policy_forward(s, prep, eps=None, deterministic=False):
    """PolicyNet forward via one Pallas kernel.

    s    : (B, obs_dim) float32
    prep : output of prepare_params(params)  (preprocessed once, reused)
    eps  : (B, act_dim) standard-normal noise for rsample; if None in stochastic
           mode, behaves as eps=0 (== tanh(mu)) and uses the cheaper det kernel.
    """
    B, obs_dim = s.shape
    H = prep["hidden"]
    act_dim = prep["act_dim"]
    assert obs_dim == prep["obs_dim"]

    # eps=None stochastic call reduces to tanh(mu): reuse the mu-only kernel.
    use_det = deterministic or (eps is None)

    # Batch tiling: big tiles (low per-step overhead), but >= 2 grid steps when
    # the batch allows it so v7x's two TensorCores both get work.
    B8 = _round_up(max(B, 1), 8)
    if B8 <= 8:
        TB = B8
    elif B8 <= 2048:
        TB = _round_up((B8 + 1) // 2, 8)
    else:
        TB = 1024
    B_pad = _round_up(B8, TB)
    grid = (B_pad // TB,)

    # only activation preprocessing happens per call
    s_p = jnp.pad(s.astype(jnp.bfloat16), ((0, B_pad - B), (0, 0)))

    act_spec = pl.BlockSpec((TB, obs_dim), lambda i: (i, 0))
    out_spec = pl.BlockSpec((TB, act_dim), lambda i: (i, 0))   # unpadded output stream

    def const_spec(shape):
        # weights/biases: one block covering the whole array, resident across grid
        return pl.BlockSpec(shape, lambda i: (0, 0))

    cparams = pltpu.CompilerParams(dimension_semantics=("parallel",))
    flops_trunk = 2 * B_pad * (obs_dim * H + H * H)
    weight_bytes_common = int((prep["w1"].size + prep["w2"].size) * 2
                              + (prep["b1"].size + prep["b2"].size) * 4)

    if use_det:
        muw = prep["wmu"].shape[1]
        cost = pl.CostEstimate(
            flops=int(flops_trunk + 2 * B_pad * H * muw),
            transcendentals=int(B_pad * act_dim),
            bytes_accessed=int(s_p.size * 2 + weight_bytes_common
                               + prep["wmu"].size * 2 + prep["bmu"].size * 4
                               + B_pad * act_dim * 4),
        )
        out = pl.pallas_call(
            _policy_kernel_det,
            out_shape=jax.ShapeDtypeStruct((B_pad, act_dim), jnp.float32),
            grid=grid,
            in_specs=[act_spec,
                      const_spec((obs_dim, H)), const_spec((1, H)),
                      const_spec((H, H)), const_spec((1, H)),
                      const_spec((H, muw)), const_spec((1, muw))],
            out_specs=out_spec,
            compiler_params=cparams,
            cost_estimate=cost,
        )(s_p, prep["w1"], prep["b1"], prep["w2"], prep["b2"],
          prep["wmu"], prep["bmu"])
        return out[:B]

    headw = prep["wh"].shape[1]
    eps_p = jnp.pad(eps.astype(jnp.float32), ((0, B_pad - B), (0, 0)))
    eps_spec = pl.BlockSpec((TB, act_dim), lambda i: (i, 0))   # unpadded eps stream

    cost = pl.CostEstimate(
        flops=int(flops_trunk + 2 * B_pad * H * headw),
        transcendentals=int(2 * B_pad * act_dim),
        bytes_accessed=int(s_p.size * 2 + weight_bytes_common
                           + prep["wh"].size * 2 + prep["bh"].size * 4
                           + eps_p.size * 4 + B_pad * act_dim * 4),
    )
    out = pl.pallas_call(
        _policy_kernel_stoch,
        out_shape=jax.ShapeDtypeStruct((B_pad, act_dim), jnp.float32),
        grid=grid,
        in_specs=[act_spec,
                  const_spec((obs_dim, H)), const_spec((1, H)),
                  const_spec((H, H)), const_spec((1, H)),
                  const_spec((H, headw)), const_spec((1, headw)),
                  eps_spec],
        out_specs=out_spec,
        compiler_params=cparams,
        cost_estimate=cost,
    )(s_p, prep["w1"], prep["b1"], prep["w2"], prep["b2"],
      prep["wh"], prep["bh"], eps_p)
    return out[:B]


# ---------------------------------------------------------------------------
# Params / reference
# ---------------------------------------------------------------------------
def init_params(key, obs_dim, act_dim):
    """Deterministic PyTorch-style (Kaiming-uniform-ish) init for nn.Linear layers."""
    def linear(k, fan_in, fan_out):
        kw, kb = jax.random.split(k)
        bound = 1.0 / jnp.sqrt(jnp.float32(fan_in))
        w = jax.random.uniform(kw, (fan_in, fan_out), jnp.float32, -bound, bound)
        b = jax.random.uniform(kb, (1, fan_out), jnp.float32, -bound, bound)
        return w, b

    k1, k2, k3, k4 = jax.random.split(key, 4)
    w1, b1 = linear(k1, obs_dim, HIDDEN)
    w2, b2 = linear(k2, HIDDEN, HIDDEN)
    wmu, bmu = linear(k3, HIDDEN, act_dim)
    wsig, bsig = linear(k4, HIDDEN, act_dim)
    return dict(w1=w1, b1=b1, w2=w2, b2=b2,
                wmu=wmu, bmu=bmu, wsig=wsig, bsig=bsig)


def _reference_forward(s, params, eps, deterministic=False):
    """Pure-JAX reference mirroring the PyTorch module, with the same bf16
    MXU-operand / f32-accumulation numerics as the kernel."""
    bf = jnp.bfloat16
    x = jnp.dot(s.astype(bf), params["w1"].astype(bf),
                preferred_element_type=jnp.float32) + params["b1"]
    x = jnp.maximum(x, 0.0)
    x = jnp.dot(x.astype(bf), params["w2"].astype(bf),
                preferred_element_type=jnp.float32) + params["b2"]
    x = jnp.maximum(x, 0.0)
    mu = jnp.dot(x.astype(bf), params["wmu"].astype(bf),
                 preferred_element_type=jnp.float32) + params["bmu"]
    if deterministic:
        return jnp.tanh(mu)
    log_sigma = jnp.dot(x.astype(bf), params["wsig"].astype(bf),
                        preferred_element_type=jnp.float32) + params["bsig"]
    log_sigma = jnp.clip(log_sigma, -20.0, 2.0)
    return jnp.tanh(mu + jnp.exp(log_sigma) * eps)


if __name__ == "__main__":
    obs_dim, act_dim, batch = 16, 8, 2

    key = jax.random.PRNGKey(0)
    k_params, k_obs, k_eps = jax.random.split(key, 3)

    params = init_params(k_params, obs_dim, act_dim)
    prep = prepare_params(params)            # one-time weight preprocessing
    s = jax.random.normal(k_obs, (batch, obs_dim), jnp.float32)
    eps = jax.random.normal(k_eps, (batch, act_dim), jnp.float32)  # rsample noise

    # stochastic path
    out = policy_forward(s, prep, eps=eps, deterministic=False)
    out = jax.block_until_ready(out)

    # deterministic path (tanh(mu), sigma branch skipped entirely)
    out_det = policy_forward(s, prep, deterministic=True)
    out_det = jax.block_until_ready(out_det)

    # eps=None stochastic call routes to the cheap mu-only kernel (== tanh(mu))
    out_mean = policy_forward(s, prep, eps=None, deterministic=False)
    out_mean = jax.block_until_ready(out_mean)

    # verify against pure-JAX reference (same bf16-matmul numerics; results
    # therefore differ from a pure-f32 PyTorch forward at the bf16 level)
    ref = _reference_forward(s, params, eps, deterministic=False)
    ref_det = _reference_forward(s, params, eps, deterministic=True)
    assert out.shape == (batch, act_dim) and out_det.shape == (batch, act_dim)
    assert jnp.allclose(out, ref, atol=2e-3, rtol=2e-3), \
        f"stochastic mismatch: {jnp.max(jnp.abs(out - ref))}"
    assert jnp.allclose(out_det, ref_det, atol=2e-3, rtol=2e-3), \
        f"deterministic mismatch: {jnp.max(jnp.abs(out_det - ref_det))}"
    assert jnp.allclose(out_mean, ref_det, atol=2e-3, rtol=2e-3), \
        f"eps=None mismatch: {jnp.max(jnp.abs(out_mean - ref_det))}"

    print("KERNEL_OK")
</pallas_src>

<mosaic_0001>
module attributes {stable_mosaic.version = 11 : i64} {
  func.func @_policy_kernel_stoch(%arg0: i32, %arg1: memref<8x16xbf16, #tpu.memory_space<vmem>>, %arg2: memref<16x256xbf16, #tpu.memory_space<vmem>>, %arg3: memref<1x256xf32, #tpu.memory_space<vmem>>, %arg4: memref<256x256xbf16, #tpu.memory_space<vmem>>, %arg5: memref<1x256xf32, #tpu.memory_space<vmem>>, %arg6: memref<256x128xbf16, #tpu.memory_space<vmem>>, %arg7: memref<1x128xf32, #tpu.memory_space<vmem>>, %arg8: memref<8x8xf32, #tpu.memory_space<vmem>>, %arg9: memref<8x8xf32, #tpu.memory_space<vmem>>) attributes {dimension_semantics = [#tpu.dimension_semantics<parallel>], iteration_bounds = array<i64: 1>, scalar_prefetch = 0 : i64, scratch_operands = 0 : i64, tpu.core_type = #tpu.core_type<tc>, window_params = [{transform_indices = @transform_0, window_bounds = array<i64: 8, 16>}, {pipeline_mode = #tpu.pipeline_mode<synchronous>, transform_indices = @transform_1, window_bounds = array<i64: 16, 256>}, {pipeline_mode = #tpu.pipeline_mode<synchronous>, transform_indices = @transform_2, window_bounds = array<i64: 1, 256>}, {pipeline_mode = #tpu.pipeline_mode<synchronous>, transform_indices = @transform_3, window_bounds = array<i64: 256, 256>}, {pipeline_mode = #tpu.pipeline_mode<synchronous>, transform_indices = @transform_4, window_bounds = array<i64: 1, 256>}, {pipeline_mode = #tpu.pipeline_mode<synchronous>, transform_indices = @transform_5, window_bounds = array<i64: 256, 128>}, {pipeline_mode = #tpu.pipeline_mode<synchronous>, transform_indices = @transform_6, window_bounds = array<i64: 1, 128>}, {transform_indices = @transform_7, window_bounds = array<i64: 8, 8>}, {transform_indices = @transform_8, window_bounds = array<i64: 8, 8>}]} {
    %c0 = arith.constant 0 : index
    %c0_0 = arith.constant 0 : index
    %0 = vector.load %arg1[%c0, %c0_0] : memref<8x16xbf16, #tpu.memory_space<vmem>>, vector<8x16xbf16>
    %c0_1 = arith.constant 0 : index
    %c0_2 = arith.constant 0 : index
    %1 = vector.load %arg2[%c0_1, %c0_2] : memref<16x256xbf16, #tpu.memory_space<vmem>>, vector<16x256xbf16>
    %cst = arith.constant dense<0.000000e+00> : vector<8x256xf32>
    %2 = tpu.matmul %0, %1, %cst {dimension_numbers = #tpu.dot_dimension_numbers<[1], [0], [0], [1], [0, 0, 1, 1], [], []>} : vector<8x16xbf16>, vector<16x256xbf16>, vector<8x256xf32> -> vector<8x256xf32>
    %c0_3 = arith.constant 0 : index
    %c0_4 = arith.constant 0 : index
    %3 = vector.load %arg3[%c0_3, %c0_4] : memref<1x256xf32, #tpu.memory_space<vmem>>, vector<1x256xf32>
    %4 = vector.broadcast %3 : vector<1x256xf32> to vector<8x256xf32>
    %5 = arith.addf %2, %4 : vector<8x256xf32>
    %cst_5 = arith.constant 0.000000e+00 : f32
    %6 = vector.broadcast %cst_5 : f32 to vector<8x256xf32>
    %7 = arith.maximumf %5, %6 : vector<8x256xf32>
    %8 = arith.truncf %7 : vector<8x256xf32> to vector<8x256xbf16>
    %c0_6 = arith.constant 0 : index
    %c0_7 = arith.constant 0 : index
    %9 = vector.load %arg4[%c0_6, %c0_7] : memref<256x256xbf16, #tpu.memory_space<vmem>>, vector<256x256xbf16>
    %cst_8 = arith.constant dense<0.000000e+00> : vector<8x256xf32>
    %10 = tpu.matmul %8, %9, %cst_8 {dimension_numbers = #tpu.dot_dimension_numbers<[1], [0], [0], [1], [0, 0, 1, 1], [], []>} : vector<8x256xbf16>, vector<256x256xbf16>, vector<8x256xf32> -> vector<8x256xf32>
    %c0_9 = arith.constant 0 : index
    %c0_10 = arith.constant 0 : index
    %11 = vector.load %arg5[%c0_9, %c0_10] : memref<1x256xf32, #tpu.memory_space<vmem>>, vector<1x256xf32>
    %12 = vector.broadcast %11 : vector<1x256xf32> to vector<8x256xf32>
    %13 = arith.addf %10, %12 : vector<8x256xf32>
    %cst_11 = arith.constant 0.000000e+00 : f32
    %14 = vector.broadcast %cst_11 : f32 to vector<8x256xf32>
    %15 = arith.maximumf %13, %14 : vector<8x256xf32>
    %16 = arith.truncf %15 : vector<8x256xf32> to vector<8x256xbf16>
    %c0_12 = arith.constant 0 : index
    %c0_13 = arith.constant 0 : index
    %17 = vector.load %arg6[%c0_12, %c0_13] : memref<256x128xbf16, #tpu.memory_space<vmem>>, vector<256x128xbf16>
    %cst_14 = arith.constant dense<0.000000e+00> : vector<8x128xf32>
    %18 = tpu.matmul %16, %17, %cst_14 {dimension_numbers = #tpu.dot_dimension_numbers<[1], [0], [0], [1], [0, 0, 1, 1], [], []>} : vector<8x256xbf16>, vector<256x128xbf16>, vector<8x128xf32> -> vector<8x128xf32>
    %c0_15 = arith.constant 0 : index
    %c0_16 = arith.constant 0 : index
    %19 = vector.load %arg7[%c0_15, %c0_16] : memref<1x128xf32, #tpu.memory_space<vmem>>, vector<1x128xf32>
    %20 = vector.broadcast %19 : vector<1x128xf32> to vector<8x128xf32>
    %21 = arith.addf %18, %20 : vector<8x128xf32>
    %22 = vector.extract_strided_slice %21 {offsets = [0, 0], sizes = [8, 8], strides = [1, 1]} : vector<8x128xf32> to vector<8x8xf32>
    %23 = vector.extract_strided_slice %21 {offsets = [0, 64], sizes = [8, 8], strides = [1, 1]} : vector<8x128xf32> to vector<8x8xf32>
    %cst_17 = arith.constant -2.000000e+01 : f32
    %cst_18 = arith.constant 2.000000e+00 : f32
    %24 = vector.broadcast %cst_17 : f32 to vector<8x8xf32>
    %25 = arith.maximumf %24, %23 : vector<8x8xf32>
    %26 = vector.broadcast %cst_18 : f32 to vector<8x8xf32>
    %27 = arith.minimumf %26, %25 : vector<8x8xf32>
    %28 = math.exp %27 : vector<8x8xf32>
    %c0_19 = arith.constant 0 : index
    %c0_20 = arith.constant 0 : index
    %29 = vector.load %arg8[%c0_19, %c0_20] : memref<8x8xf32, #tpu.memory_space<vmem>>, vector<8x8xf32>
    %30 = arith.mulf %28, %29 : vector<8x8xf32>
    %31 = arith.addf %22, %30 : vector<8x8xf32>
    %32 = math.tanh %31 : vector<8x8xf32>
    %c0_21 = arith.constant 0 : index
    %c0_22 = arith.constant 0 : index
    %33 = vector.load %arg9[%c0_21, %c0_22] : memref<8x8xf32, #tpu.memory_space<vmem>>, vector<8x8xf32>
    tpu.vector_store %arg9[%c0_21, %c0_22], %32 {strides = array<i32>} : memref<8x8xf32, #tpu.memory_space<vmem>>, vector<8x8xf32>,
    return
  }
  func.func @transform_0(%arg0: i32) -> (i32, i32) {
    %c0_i32 = arith.constant 0 : i32
    %c0_i32_0 = arith.constant 0 : i32
    return %arg0, %c0_i32 : i32, i32
  }
  func.func @transform_1(%arg0: i32) -> (i32, i32) {
    %c0_i32 = arith.constant 0 : i32
    %c0_i32_0 = arith.constant 0 : i32
    %c0_i32_1 = arith.constant 0 : i32
    return %c0_i32, %c0_i32_0 : i32, i32
  }
  func.func @transform_2(%arg0: i32) -> (i32, i32) {
    %c0_i32 = arith.constant 0 : i32
    %c0_i32_0 = arith.constant 0 : i32
    %c0_i32_1 = arith.constant 0 : i32
    return %c0_i32, %c0_i32_0 : i32, i32
  }
  func.func @transform_3(%arg0: i32) -> (i32, i32) {
    %c0_i32 = arith.constant 0 : i32
    %c0_i32_0 = arith.constant 0 : i32
    %c0_i32_1 = arith.constant 0 : i32
    return %c0_i32, %c0_i32_0 : i32, i32
  }
  func.func @transform_4(%arg0: i32) -> (i32, i32) {
    %c0_i32 = arith.constant 0 : i32
    %c0_i32_0 = arith.constant 0 : i32
    %c0_i32_1 = arith.constant 0 : i32
    return %c0_i32, %c0_i32_0 : i32, i32
  }
  func.func @transform_5(%arg0: i32) -> (i32, i32) {
    %c0_i32 = arith.constant 0 : i32
    %c0_i32_0 = arith.constant 0 : i32
    %c0_i32_1 = arith.constant 0 : i32
    return %c0_i32, %c0_i32_0 : i32, i32
  }
  func.func @transform_6(%arg0: i32) -> (i32, i32) {
    %c0_i32 = arith.constant 0 : i32
    %c0_i32_0 = arith.constant 0 : i32
    %c0_i32_1 = arith.constant 0 : i32
    return %c0_i32, %c0_i32_0 : i32, i32
  }
  func.func @transform_7(%arg0: i32) -> (i32, i32) {
    %c0_i32 = arith.constant 0 : i32
    %c0_i32_0 = arith.constant 0 : i32
    return %arg0, %c0_i32 : i32, i32
  }
  func.func @transform_8(%arg0: i32) -> (i32, i32) {
    %c0_i32 = arith.constant 0 : i32
    %c0_i32_0 = arith.constant 0 : i32
    return %arg0, %c0_i32 : i32, i32
  }
}

</mosaic_0001>

<bundles_post_ra>
// kernel: tpu_custom_call.1
= control target key start
LH: loop header
LB: loop body
LE: loop exit
PB: predicated region body
PF: predicated region fallthrough
CT: control target
= control target key end

     0   :  { %13 = vsyncpa [#allocation3], 0  ;;  %s1157_s0 = inlined_call_operand.hbm [shape: bf16[8,16], index: 0, kind: input, shape index: {}]   ;;  %s1158_s1 = inlined_call_operand.hbm [shape: bf16[16,256], index: 1, kind: input, shape index: {}]   ;;  %s1159_s2 = inlined_call_operand.hbm [shape: f32[1,256], index: 2, kind: input, shape index: {}]   ;;  %s1160_s3 = inlined_call_operand.hbm [shape: bf16[256,256], index: 3, kind: input, shape index: {}]   ;;  %s1161_s4 = inlined_call_operand.vmem [shape: f32[1,256], index: 4, kind: input, shape index: {}]   ;;  %s1162_s5 = inlined_call_operand.hbm [shape: bf16[256,128], index: 5, kind: input, shape index: {}]   ;;  %s1163_s6 = inlined_call_operand.vmem [shape: f32[1,128], index: 6, kind: input, shape index: {}]   ;;  %s1164_s7 = inlined_call_operand.hbm [shape: f32[8,8], index: 7, kind: input, shape index: {}]   ;;  %s1165_s8 = inlined_call_operand.hbm [shape: f32[8,8], index: 8, kind: output, shape index: {}]  }
   0x1   :  { %14 = vsyncpa [#allocation6], 0 }
   0x2   :  { %15 = vsyncpa [#allocation9], 0 }
   0x3   :  { %16 = vsyncpa [#allocation12], 0  ;;  %s33_s29 = sshll.u32 %s1158_s1, 4  ;;  %s34_s29 = int_to_ptr.hbm [resolvable:$true] %s33_s29 }
   0x4   :  { %17 = vsyncpa [#allocation4], 0  ;;  %s1068_s30 = smov [#allocation5]   ;;  %s57_s12 = sshll.u32 %s1160_s3, 4  ;;  %s58_s12 = int_to_ptr.hbm [resolvable:$true] %s57_s12 }
   0x5   :  { %s35_s9 = sshll.u32 %s1068_s30, 4  ;;  %s1069_s13 = smov 128   ;;  %s36_s9 = int_to_ptr.vmem [resolvable:$true] %s35_s9 }
   0x6   :  { %s1070_s14 = smov 8   ;;  %s1071_s15 = smov [#allocation8]  }
   0x7   :  { %41 = dma.hbm_to_vmem [thread:$0]  %s34_s29, 256, %s36_s9, [#allocation6], %s1069_s13, %s1069_s13, %s1070_s14  }
   0x8   :  { %s59_s16 = sshll.u32 %s1071_s15, 4  ;;  %s23_s19 = sshll.u32 %s1157_s0, 4  ;;  %s60_s16 = int_to_ptr.vmem [resolvable:$true] %s59_s16  ;;  %s24_s19 = int_to_ptr.hbm [resolvable:$true] %s23_s19 }
   0x9   :  { %65 = dma.hbm_to_vmem [thread:$0]  %s58_s12, 4096, %s60_s16, [#allocation9], %s1069_s13, %s1069_s13, %s1070_s14  }
   0xa   :  { %s47_s21 = sshll.u32 %s1159_s2, 4  ;;  %s1072_s22 = smov [#allocation2]   ;;  %s48_s21 = int_to_ptr.hbm [resolvable:$true] %s47_s21 }
   0xb   :  { %s25_s23 = sshll.u32 %s1072_s22, 4  ;;  %s1073_s3 = smov [#allocation7]   ;;  %s26_s23 = int_to_ptr.vmem [resolvable:$true] %s25_s23 }
   0xc   :  { %28 = dma.hbm_to_vmem [thread:$0]  %s24_s19, 64, %s26_s23, [#allocation3]  }
   0xd   :  { %s49_s24 = sshll.u32 %s1073_s3, 4  ;;  %s72_s27 = sshll.u32 %s1162_s5, 4  ;;  %s50_s24 = int_to_ptr.vmem [resolvable:$true] %s49_s24  ;;  %s73_s27 = int_to_ptr.hbm [resolvable:$true] %s72_s27 }
   0xe   :  { %52 = dma.hbm_to_vmem [thread:$0]  %s48_s21, 32, %s50_s24, [#allocation6]  }
   0xf   :  { %s1074_s0 = smov [#allocation10]   ;;  %s88_s2 = sshll.u32 %s1164_s7, 4  ;;  %s89_s2 = int_to_ptr.hbm [resolvable:$true] %s88_s2 }
  0x10   :  { %s74_s28 = sshll.u32 %s1074_s0, 4  ;;  %s1075_s9 = smov 64   ;;  %s75_s28 = int_to_ptr.vmem [resolvable:$true] %s74_s28 }
  0x11   :  { %s1076_s10 = smov 4   ;;  %s1077_s11 = smov [#allocation11]  }
  0x12   :  { %80 = dma.hbm_to_vmem [thread:$0]  %s73_s27, 2048, %s75_s28, [#allocation9], %s1075_s9, %s1075_s9, %s1076_s10  }
  0x13   :  { %s90_s12 = sshll.u32 %s1077_s11, 4  ;;  %s91_s12 = int_to_ptr.vmem [resolvable:$true] %s90_s12 }
  0x14   :  { %93 = dma.hbm_to_vmem [thread:$0]  %s89_s2, 128, %s91_s12, [#allocation12]  }
  0x15   :  { %1058 = dma.done.wait [#allocation3], 64  }
  0x16   :  { %1059 = vsyncadd [#allocation3], 4294967232 }
  0x17   :  { %1060 = dma.done.wait [#allocation6], 288  }
  0x18   :  { %1061 = vsyncadd [#allocation6], 4294967008 }
  0x19   :  { %1062 = dma.done.wait [#allocation9], 6144  }
  0x1a   :  { %1063 = vsyncadd [#allocation9], 4294961152 }
  0x1b   :  { %1064 = dma.done.wait [#allocation12], 128  }
  0x1c   :  { %1065 = vsyncadd [#allocation12], 4294967168  ;;  %vm138_vm0 = vcmask 130048   ;;  %v624_v0 = vld [vmem:[#allocation5] sm:$0xf]  ;;  %s1078_s14 = smov [#allocation13]  }
  0x1d   :  { %v825_v1 = vld [vmem:[#allocation5 + $0x4] sm:$0xf0]  ;;  %v824_v2 = vld [vmem:[#allocation5 + $0x4] sm:$0xf]  ;;  %v626_v4 = vld [vmem:[#allocation5 + $0x8] sm:$0xf0] }
  0x1e   :  { %v625_v3 = vor.u32 %v825_v1, %v624_v0  ;;  %v119_v5 = vld [vmem:[#allocation2] sm:$0xf]  ;;  %v690_v6 = vld [vmem:[#allocation8 + $0x70] sm:$0xf]  ;;  %v629_v7 = vor.u32 %v824_v2, %v626_v4  ;;  %v841_v8 = vld [vmem:[#allocation8 + $0x74] sm:$0xf0] }
  0x1f   :  { %v754_v9 = vld [vmem:[#allocation8 + $0xf0] sm:$0xf]  ;;  %v857_v10 = vld [vmem:[#allocation8 + $0xf4] sm:$0xf0]  ;;  %v691_v11 = vor.u32 %v841_v8, %v690_v6  ;;  %v840_v13 = vld [vmem:[#allocation8 + $0x74] sm:$0xf] }
  0x20   :  { %149 = vmatpush.bf16.msra.mxu0 %v625_v3  ;;  %v755_v12 = vor.u32 %v857_v10, %v754_v9  ;;  %v692_v14 = vld [vmem:[#allocation8 + $0x78] sm:$0xf0]  ;;  %v856_v15 = vld [vmem:[#allocation8 + $0xf4] sm:$0xf]  ;;  %162 = vmatpush.bf16.msra.mxu1 %v629_v7  ;;  %v682_v18 = vld [vmem:[#allocation8 + $0x60] sm:$0xf] }
  0x21   :  { %v695_v16 = vor.u32 %v840_v13, %v692_v14  ;;  %v756_v17 = vld [vmem:[#allocation8 + $0xf8] sm:$0xf0]  ;;  %v839_v19 = vld [vmem:[#allocation8 + $0x64] sm:$0xf0]  ;;  %370 = vmatpush.bf16.msra.mxu2 %v691_v11  ;;  %v746_v22 = vld [vmem:[#allocation8 + $0xe0] sm:$0xf] }
  0x22   :  { %383 = vmatpush.bf16.msra.mxu3 %v755_v12  ;;  %v759_v20 = vor.u32 %v856_v15, %v756_v17  ;;  %v683_v21 = vor.u32 %v839_v19, %v682_v18  ;;  %v855_v23 = vld [vmem:[#allocation8 + $0xe4] sm:$0xf0]  ;;  %v838_v24 = vld [vmem:[#allocation8 + $0x64] sm:$0xf]  ;;  %v684_v26 = vld [vmem:[#allocation8 + $0x68] sm:$0xf0] }
  0x23   :  { %630 = vmatmul.msk.bf16.vlgmr.msra.gmra.mxu0 %vm138_vm0, %v119_v5  ;;  %v747_v25 = vor.u32 %v855_v23, %v746_v22  ;;  %v854_v27 = vld [vmem:[#allocation8 + $0xe4] sm:$0xf]  ;;  %v748_v28 = vld [vmem:[#allocation8 + $0xe8] sm:$0xf0]  ;;  %631 = vmatmul.msk.bf16.vlgmr.msra.gmra.mxu1 %vm138_vm0, %v119_v5  ;;  %v687_v29 = vor.u32 %v838_v24, %v684_v26  ;;  %v674_v30 = vld [vmem:[#allocation8 + $0x50] sm:$0xf] }
  0x24   :  { %396 = vmatpush.bf16.msrb.mxu0 %v695_v16  ;;  %v837_v31 = vld [vmem:[#allocation8 + $0x54] sm:$0xf0]  ;;  %v738_v32 = vld [vmem:[#allocation8 + $0xd0] sm:$0xf]  ;;  %409 = vmatpush.bf16.msrb.mxu1 %v759_v20  ;;  %v751_v33 = vor.u32 %v854_v27, %v748_v28  ;;  %v836_v35 = vld [vmem:[#allocation8 + $0x54] sm:$0xf] }
  0x25   :  { %v853_v34 = vld [vmem:[#allocation8 + $0xd4] sm:$0xf0]  ;;  %v676_v36 = vld [vmem:[#allocation8 + $0x58] sm:$0xf0]  ;;  %371 = vmatpush.bf16.msra.mxu2 %v683_v21  ;;  %v675_v37 = vor.u32 %v837_v31, %v674_v30  ;;  %v852_v39 = vld [vmem:[#allocation8 + $0xd4] sm:$0xf] }
  0x26   :  { %384 = vmatpush.bf16.msra.mxu3 %v747_v25  ;;  %v739_v38 = vor.u32 %v853_v34, %v738_v32  ;;  %v740_v40 = vld [vmem:[#allocation8 + $0xd8] sm:$0xf0]  ;;  %v666_v41 = vld [vmem:[#allocation8 + $0x40] sm:$0xf]  ;;  %v835_v42 = vld [vmem:[#allocation8 + $0x44] sm:$0xf0]  ;;  %v679_v45 = vor.u32 %v836_v35, %v676_v36 }
  0x27   :  { %v730_v43 = vld [vmem:[#allocation8 + $0xc0] sm:$0xf]  ;;  %v851_v44 = vld [vmem:[#allocation8 + $0xc4] sm:$0xf0]  ;;  %v743_v46 = vor.u32 %v852_v39, %v740_v40  ;;  %v834_v47 = vld [vmem:[#allocation8 + $0x44] sm:$0xf]  ;;  %v667_v49 = vor.u32 %v835_v42, %v666_v41 }
  0x28   :  { %397 = vmatpush.bf16.msrb.mxu0 %v687_v29  ;;  %410 = vmatpush.bf16.msrb.mxu1 %v751_v33  ;;  %v668_v48 = vld [vmem:[#allocation8 + $0x48] sm:$0xf0]  ;;  %v731_v50 = vor.u32 %v851_v44, %v730_v43  ;;  %v850_v51 = vld [vmem:[#allocation8 + $0xc4] sm:$0xf]  ;;  %v658_v53 = vld [vmem:[#allocation8 + $0x30] sm:$0xf] }
  0x29   :  { %372 = vmatpush.bf16.msra.mxu2 %v675_v37  ;;  %v732_v52 = vld [vmem:[#allocation8 + $0xc8] sm:$0xf0]  ;;  %v833_v54 = vld [vmem:[#allocation8 + $0x34] sm:$0xf0]  ;;  %v722_v55 = vld [vmem:[#allocation8 + $0xb0] sm:$0xf]  ;;  %v671_v57 = vor.u32 %v834_v47, %v668_v48 }
  0x2a   :  { %385 = vmatpush.bf16.msra.mxu3 %v739_v38  ;;  %v849_v56 = vld [vmem:[#allocation8 + $0xb4] sm:$0xf0]  ;;  %v735_v58 = vor.u32 %v850_v51, %v732_v52  ;;  %v832_v59 = vld [vmem:[#allocation8 + $0x34] sm:$0xf]  ;;  %v660_v60 = vld [vmem:[#allocation8 + $0x38] sm:$0xf0]  ;;  %v659_v62 = vor.u32 %v833_v54, %v658_v53 }
  0x2b   :  { %v848_v61 = vld [vmem:[#allocation8 + $0xb4] sm:$0xf]  ;;  %v723_v63 = vor.u32 %v849_v56, %v722_v55  ;;  %v724_v0 = vld [vmem:[#allocation8 + $0xb8] sm:$0xf0]  ;;  %v650_v1 = vld [vmem:[#allocation8 + $0x20] sm:$0xf]  ;;  %v663_v5 = vor.u32 %v832_v59, %v660_v60 }
  0x2c   :  { %398 = vmatpush.bf16.msrb.mxu0 %v679_v45  ;;  %411 = vmatpush.bf16.msrb.mxu1 %v743_v46  ;;  %v831_v2 = vld [vmem:[#allocation8 + $0x24] sm:$0xf0]  ;;  %v714_v3 = vld [vmem:[#allocation8 + $0xa0] sm:$0xf]  ;;  %v727_v6 = vor.u32 %v848_v61, %v724_v0  ;;  %v830_v7 = vld [vmem:[#allocation8 + $0x24] sm:$0xf] }
  0x2d   :  { %373 = vmatpush.bf16.msra.mxu2 %v667_v49  ;;  %v847_v4 = vld [vmem:[#allocation8 + $0xa4] sm:$0xf0]  ;;  %v652_v8 = vld [vmem:[#allocation8 + $0x28] sm:$0xf0]  ;;  %v651_v9 = vor.u32 %v831_v2, %v650_v1  ;;  %v846_v11 = vld [vmem:[#allocation8 + $0xa4] sm:$0xf] }
  0x2e   :  { %386 = vmatpush.bf16.msra.mxu3 %v731_v50  ;;  %v715_v10 = vor.u32 %v847_v4, %v714_v3  ;;  %v716_v12 = vld [vmem:[#allocation8 + $0xa8] sm:$0xf0]  ;;  %v655_v13 = vor.u32 %v830_v7, %v652_v8  ;;  %v642_v15 = vld [vmem:[#allocation8 + $0x10] sm:$0xf]  ;;  %v829_v16 = vld [vmem:[#allocation8 + $0x14] sm:$0xf0] }
  0x2f   :  { %v719_v14 = vor.u32 %v846_v11, %v716_v12  ;;  %v706_v17 = vld [vmem:[#allocation8 + $0x90] sm:$0xf]  ;;  %v643_v18 = vor.u32 %v829_v16, %v642_v15  ;;  %v845_v19 = vld [vmem:[#allocation8 + $0x94] sm:$0xf0]  ;;  %v828_v20 = vld [vmem:[#allocation8 + $0x14] sm:$0xf] }
  0x30   :  { %399 = vmatpush.bf16.msrb.mxu0 %v671_v57  ;;  %412 = vmatpush.bf16.msrb.mxu1 %v735_v58  ;;  %v644_v21 = vld [vmem:[#allocation8 + $0x18] sm:$0xf0]  ;;  %v707_v22 = vor.u32 %v845_v19, %v706_v17  ;;  %v844_v24 = vld [vmem:[#allocation8 + $0x94] sm:$0xf]  ;;  %v634_v27 = vld [vmem:[#allocation8] sm:$0xf] }
  0x31   :  { %374 = vmatpush.bf16.msra.mxu2 %v659_v62  ;;  %v647_v23 = vor.u32 %v828_v20, %v644_v21  ;;  %v708_v25 = vld [vmem:[#allocation8 + $0x98] sm:$0xf0]  ;;  %v827_v28 = vld [vmem:[#allocation8 + $0x4] sm:$0xf0]  ;;  %v698_v29 = vld [vmem:[#allocation8 + $0x80] sm:$0xf] }
  0x32   :  { %387 = vmatpush.bf16.msra.mxu3 %v723_v63  ;;  %v711_v26 = vor.u32 %v844_v24, %v708_v25  ;;  %v635_v30 = vor.u32 %v827_v28, %v634_v27  ;;  %v843_v31 = vld [vmem:[#allocation8 + $0x84] sm:$0xf0]  ;;  %v826_v32 = vld [vmem:[#allocation8 + $0x4] sm:$0xf]  ;;  %v636_v33 = vld [vmem:[#allocation8 + $0x8] sm:$0xf0] }
  0x33   :  { %v699_v34 = vor.u32 %v843_v31, %v698_v29  ;;  %v639_v35 = vor.u32 %v826_v32, %v636_v33  ;;  %v842_v36 = vld [vmem:[#allocation8 + $0x84] sm:$0xf]  ;;  %v700_v37 = vld [vmem:[#allocation8 + $0x88] sm:$0xf0]  ;;  %v873_v39 = vld [vmem:[#allocation10 + $0x78] sm:$0xff]  ;;  %s607_s15 = sshll.u32 %s1078_s14, 4  ;;  %s608_s15 = int_to_ptr.vmem [resolvable:$true] %s607_s15 }
  0x34   :  { %400 = vmatpush.bf16.msrb.mxu0 %v663_v5  ;;  %413 = vmatpush.bf16.msrb.mxu1 %v727_v6  ;;  %v703_v38 = vor.u32 %v842_v36, %v700_v37  ;;  %v865_v40 = vld [vmem:[#allocation10 + $0x38] sm:$0xff]  ;;  %v872_v41 = vld [vmem:[#allocation10 + $0x70] sm:$0xff]  ;;  %v871_v43 = vld [vmem:[#allocation10 + $0x68] sm:$0xff]  ;;  %s609_s17 = sshll.u32 %s1165_s8, 4  ;;  %vm600_vm1 = vcmask 64512   ;;  %s610_s17 = int_to_ptr.hbm [resolvable:$true] %s609_s17 }
  0x35   :  { %375 = vmatpush.bf16.msra.mxu2 %v651_v9  ;;  %v864_v42 = vld [vmem:[#allocation10 + $0x30] sm:$0xff]  ;;  %v863_v44 = vld [vmem:[#allocation10 + $0x28] sm:$0xff]  ;;  %v870_v45 = vld [vmem:[#allocation10 + $0x60] sm:$0xff] }
  0x36   :  { %388 = vmatpush.bf16.msra.mxu3 %v715_v10  ;;  %v862_v46 = vld [vmem:[#allocation10 + $0x20] sm:$0xff]  ;;  %v869_v47 = vld [vmem:[#allocation10 + $0x58] sm:$0xff]  ;;  %v868_v49 = vld [vmem:[#allocation10 + $0x50] sm:$0xff] }
  0x37   :  { %v122_v48 = vld [vmem:[#allocation7] sm:$0x3]  ;;  %v867_v63 = vld [vmem:[#allocation10 + $0x48] sm:$0xff]  ;;  %v860_v0 = vld [vmem:[#allocation10 + $0x10] sm:$0xff] }
  0x38   :  { %401 = vmatpush.bf16.msrb.mxu0 %v655_v13  ;;  %414 = vmatpush.bf16.msrb.mxu1 %v719_v14  ;;  %v124_v50 = vperm.slane %v122_v48, 0  ;;  %v125_v51 = vperm.slane %v122_v48, 1  ;;  %v861_v62 = vld [vmem:[#allocation10 + $0x18] sm:$0xff]  ;;  %v866_v1 = vld [vmem:[#allocation10 + $0x40] sm:$0xff]  ;;  %v859_v2 = vld [vmem:[#allocation10 + $0x8] sm:$0xff] }
  0x39   :  { %376 = vmatpush.bf16.msra.mxu2 %v643_v18  ;;  %v858_v3 = vld [vmem:[#allocation10] sm:$0xff]  ;;  %v204_v5 = vld [vmem:[%s1161_s4] sm:$0x3] }
  0x3a   :  { %389 = vmatpush.bf16.msra.mxu3 %v707_v22  ;;  %v588_v4 = vld [vmem:[#allocation11] sm:$0xff]  ;;  %v207_v6 = vperm.slane %v204_v5, 1  ;;  %v206_v11 = vperm.slane %v204_v5, 0  ;;  %v885_v25 = vld [vmem:[%s1163_s6] ss:$0 sm:$0xff] }
  0x3b   :  { %590 = vrot.lane.b32.xlu0 %v588_v4, %s1075_s9 }
  0x3c   :  { %402 = vmatpush.bf16.msrb.mxu0 %v647_v23  ;;  %415 = vmatpush.bf16.msrb.mxu1 %v711_v26 }
  0x3d   :  { %377 = vmatpush.bf16.msra.mxu2 %v635_v30 }
  0x3e   :  { %390 = vmatpush.bf16.msra.mxu3 %v699_v34 }
  0x40   :  { %403 = vmatpush.bf16.msrb.mxu0 %v639_v35  ;;  %416 = vmatpush.bf16.msrb.mxu1 %v703_v38 }
  0x41   :  { %558 = vmatpush.bf16.msrb.mxu2 %v865_v40 }
  0x42   :  { %571 = vmatpush.bf16.msrb.mxu3 %v873_v39 }
  0x45   :  { %559 = vmatpush.bf16.msrb.mxu2 %v864_v42 }
  0x46   :  { %572 = vmatpush.bf16.msrb.mxu3 %v872_v41 }
  0x49   :  { %560 = vmatpush.bf16.msrb.mxu2 %v863_v44 }
  0x4a   :  { %573 = vmatpush.bf16.msrb.mxu3 %v871_v43 }
  0x4d   :  { %561 = vmatpush.bf16.msrb.mxu2 %v862_v46 }
  0x4e   :  { %574 = vmatpush.bf16.msrb.mxu3 %v870_v45 }
  0x51   :  { %562 = vmatpush.bf16.msrb.mxu2 %v861_v62 }
  0x52   :  { %575 = vmatpush.bf16.msrb.mxu3 %v869_v47 }
  0x55   :  { %563 = vmatpush.bf16.msrb.mxu2 %v860_v0 }
  0x56   :  { %576 = vmatpush.bf16.msrb.mxu3 %v868_v49 }
  0x59   :  { %564 = vmatpush.bf16.msrb.mxu2 %v859_v2 }
  0x5a   :  { %577 = vmatpush.bf16.msrb.mxu3 %v867_v63 }
  0x5d   :  { %565 = vmatpush.bf16.msrb.mxu2 %v858_v3 }
  0x5e   :  { %578 = vmatpush.bf16.msrb.mxu3 %v866_v1 }
  0xa0   :  { %v151_v52 = vpop.f32.mrf.mxu0  ;;  %v164_v54 = vpop.f32.mrf.mxu1 }
  0xa1   :  { %v152_v53 = vadd.f32 %v151_v52, %v124_v50  ;;  %v165_v55 = vadd.f32 %v164_v54, %v125_v51 }
  0xa3   :  { %v168_v56 = vmax.f32 %v152_v53, 0.0  ;;  %v169_v57 = vmax.f32 %v165_v55, 0.0 }
  0xa5   :  { %v170_v58 = vpack.c.bf16 %v168_v56, %v168_v56  ;;  %v171_v59 = vpack.c.bf16 %v169_v57, %v169_v57 }
  0xa7   :  { %378 = vmatmul.bf16.vlgmr.msra.gmra.mxu2 %v170_v58  ;;  %404 = vmatmul.bf16.vlgmr.msrb.gmra.mxu0 %v170_v58 }
  0xa8   :  { %391 = vmatmul.bf16.vlgmr.msra.gmra.mxu3 %v171_v59  ;;  %417 = vmatmul.bf16.vlgmr.msrb.gmra.mxu1 %v171_v59  ;;  %v153_v60 = vpop.f32.mrf.mxu0  ;;  %v166_v61 = vpop.f32.mrf.mxu1 }
  0xad   :  { %v591_v34 = vpop.permute.xlu0 %590 }
 0x124   :  { %v405_v7 = vpop.f32.mrf.mxu0 }
 0x125   :  { %v406_v8 = vadd.f32 %v405_v7, %v207_v6  ;;  %v418_v9 = vpop.f32.mrf.mxu1 }
 0x127   :  { %v419_v10 = vadd.f32 %v418_v9, %v406_v8 }
 0x129   :  { %v423_v12 = vmax.f32 %v419_v10, 0.0 }
 0x12a   :  { %v379_v13 = vpop.f32.mrf.mxu2 }
 0x12b   :  { %v425_v14 = vpack.c.bf16 %v423_v12, %v423_v12  ;;  %v380_v15 = vadd.f32 %v379_v13, %v206_v11  ;;  %v392_v16 = vpop.f32.mrf.mxu3 }
 0x12c   :  { %v407_v17 = vpop.f32.mrf.mxu0 }
 0x12d   :  { %v393_v18 = vadd.f32 %v392_v16, %v380_v15  ;;  %v420_v19 = vpop.f32.mrf.mxu1  ;;  %579 = vmatmul.bf16.vlgmr.msrb.gmra.mxu3 %v425_v14 }
 0x12f   :  { %v422_v20 = vmax.f32 %v393_v18, 0.0 }
 0x131   :  { %v424_v21 = vpack.c.bf16 %v422_v20, %v422_v20 }
 0x132   :  { %v381_v22 = vpop.f32.mrf.mxu2 }
 0x133   :  { %v394_v23 = vpop.f32.mrf.mxu3  ;;  %566 = vmatmul.bf16.vlgmr.msrb.gmra.mxu2 %v424_v21 }
 0x1b0   :  { %v580_v24 = vpop.f32.mrf.mxu3 }
 0x1b6   :  { %v567_v26 = vpop.f32.mrf.mxu2 }
 0x1b7   :  { %v568_v27 = vadd.f32 %v885_v25, %v567_v26 }
 0x1b8   :  { %v582_v28 = vpop.f32.mrf.mxu3 }
 0x1b9   :  { %v581_v29 = vadd.f32 %v580_v24, %v568_v27 }
 0x1bb   :  { %v584_v30 = vmax.f32 %v581_v29, -20.0 }
 0x1bd   :  { %v585_v31 = vmin.f32 %v584_v30, 2.0 }
 0x1be   :  { %v569_v32 = vpop.f32.mrf.mxu2 }
 0x1bf   :  { %v586_v33 = vmul.f32 1.442695, %v585_v31 }
 0x1c1   :  { %886 = vpow2.f32 %v586_v33 }
 0x1c7   :  { %v887_v35 = vpop.eup %886 }
 0x1c8   :  { %v593_v36 = vmul.f32 %v887_v35, %v591_v34 }
 0x1ca   :  { %595 = vrot.lane.b32.xlu0 %v593_v36, %s1075_s9 }
 0x23c   :  { %v596_v37 = vpop.permute.xlu0 %595 }
 0x23d   :  { %v598_v38 = vadd.f32 %v596_v37, %v581_v29 }
 0x23f   :  { %888 = vtanh.f32 %v598_v38 }
 0x245   :  { %v889_v39 = vpop.eup %888 }
 0x246   :  { %601 = vst.msk [vmem:[#allocation13] sm:$0xff] %vm600_vm1, %v889_v39 }
 0x247   :  { %612 = dma.vmem_to_hbm [thread:$0]  %s608_s15, 128, %s610_s17, [#allocation4]  }
 0x248   :  { %1066 = dma.done.wait [#allocation4], 128  }
 0x249   :  { %1067 = vsyncadd [#allocation4], 4294967168 }
 0x24a   :  { %617 = vsyncpa [#allocation3], 1 }
 0x24b   :  { %618 = vsyncpa [#allocation6], 1 }
 0x24c   :  { %619 = vsyncpa [#allocation9], 1 }
 0x24d   :  { %620 = vsyncpa [#allocation12], 1 }
 0x24e   :  { %621 = vsyncpa [#allocation4], 1 }

</bundles_post_ra>
